<compile_context>
chip_gen: v6e
topology: v6e:2x2x1
jax: 0.10.0
libtpu: 0.0.40
codegen_flags: <defaults>
</compile_context>

<pallas_src>
import functools

import jax
import jax.numpy as jnp
from jax import lax
from jax.experimental import pallas as pl
from jax.experimental.pallas import tpu as pltpu


_TN_PREF = 512       # pred tile (sublanes of the dist tile)
_TM_PREF = 2048      # true tile (lanes of the dist tile); dist tile = 4 MiB
_SENTINEL = 1.0e4    # padded points; squared distance ~3e8 dominates real data
_RESIDENT_TRUE_BYTES = 8 * 1024 * 1024   # per-buffer cap for full-M residency


def _chamfer_kernel(pred_ref, true_ref, d1_ref, d2p_ref, acc_ref,
                    *, true_resident):
    # pred_ref: (1, TN, 5)            rows [-2*p, ||p||^2, 1]
    # true_ref: (1, m_tiles, 5, TM)   resident; cols [q, 1, ||q||^2]
    #           (or (1, 1, 5, TM) when streamed per m tile)
    # d1_ref:   (1, 1, TN)            sqrt NN distance, pred -> true
    # d2p_ref:  (1, 1, 1, TM)         per-N-tile partial column minima (sq)
    # acc_ref:  (TN, 128)             lane-partial running row min
    m_i = pl.program_id(2)
    m_n = pl.num_programs(2)

    @pl.when(m_i == 0)
    def _():
        acc_ref[...] = jnp.full(acc_ref.shape, jnp.inf, jnp.float32)

    pred_aug = pred_ref[0]                                    # (TN, 5)
    if true_resident:
        true_aug = true_ref[0, m_i]                           # (5, TM)
    else:
        true_aug = true_ref[0, 0]                             # (5, TM)

    # Squared pairwise distances straight off the MXU: the K=5 contraction
    # carries the cross term and both norms, so no full-tile VPU adds.
    # (Mosaic's f32 matmul path is multi-pass / near-f32; validated against
    # the O(N*M) reference at 1e-4 below.)
    dist = lax.dot_general(
        pred_aug, true_aug,
        dimension_numbers=(((1,), (0,)), ((), ())),
        preferred_element_type=jnp.float32)                   # (TN, TM)

    n_chunks = dist.shape[1] // 128

    # Single pass over 128-lane chunks: lane-partial row min (d1) and
    # per-chunk column min (d2); each dist vreg is read once.
    acc = acc_ref[...]
    col_mins = []
    for c in range(n_chunks):
        v = dist[:, c * 128:(c + 1) * 128]                    # vreg-aligned
        acc = jnp.minimum(acc, v)                             # VALU vmin
        col_mins.append(jnp.min(v, axis=0, keepdims=True))    # (1, 128)
    acc_ref[...] = acc
    d2p_ref[0, 0, :, :] = jnp.concatenate(col_mins, axis=1)   # lane-dense

    @pl.when(m_i == m_n - 1)
    def _():
        # Deferred cross-lane (XLU) min + relayout + clamp + sqrt:
        # once per N tile instead of once per m step.
        row_min = jnp.min(acc, axis=1, keepdims=True)         # (TN, 1)
        d1_ref[0, 0, :] = jnp.sqrt(jnp.maximum(row_min, 0.0))[:, 0]


def _round_up(x, m):
    return ((x + m - 1) // m) * m


def _pad_points(x, n_pad):
    b, n, c = x.shape
    if n_pad == n:
        return x
    pad = jnp.full((b, n_pad - n, c), _SENTINEL, dtype=x.dtype)
    return jnp.concatenate([x, pad], axis=1)


def chamfer_sqrt_dists(y_pred, y_true, *, tn=None, tm=None):
    """Per-point sqrt NN distances: (B,1,N) pred->true and (B,1,M) true->pred."""
    B, N, _ = y_pred.shape
    _, M, _ = y_true.shape

    if tn is None:
        tn = min(_TN_PREF, _round_up(N, 128))
        # v7x megacore: keep B * n_tiles >= 2 when B == 1 and N allows it.
        if B == 1 and tn > 128 and _round_up(N, 128) <= tn:
            tn = max(128, (tn // 2) // 128 * 128)
    else:
        tn = _round_up(tn, 128)
    if tm is None:
        tm = min(_TM_PREF, _round_up(M, 128))
    else:
        tm = _round_up(tm, 128)
    TN, TM = tn, tm

    N_pad = _round_up(N, TN)
    M_pad = _round_up(M, TM)
    n_tiles = N_pad // TN
    m_tiles = M_pad // TM

    pred = _pad_points(y_pred.astype(jnp.float32), N_pad)     # (B, N_pad, 3)
    true = _pad_points(y_true.astype(jnp.float32), M_pad)     # (B, M_pad, 3)

    # Augmented operands: [-2p, ||p||^2, 1] . [q, 1, ||q||^2]^T = ||p - q||^2.
    pn = jnp.sum(pred * pred, axis=-1, keepdims=True)
    ones_p = jnp.ones((B, N_pad, 1), jnp.float32)
    pred_aug = jnp.concatenate([-2.0 * pred, pn, ones_p], axis=-1)   # (B,N_pad,5)

    qn = jnp.sum(true * true, axis=-1, keepdims=True)
    ones_q = jnp.ones((B, M_pad, 1), jnp.float32)
    true_aug = jnp.concatenate([true, ones_q, qn], axis=-1)          # (B,M_pad,5)
    # Coordinate-major per TM tile: (B, m_tiles, 5, TM).
    true_aug = jnp.transpose(true_aug.reshape(B, m_tiles, TM, 5), (0, 1, 3, 2))

    # Keep the whole true operand VMEM-resident per batch when it is small
    # enough (one HBM read per batch instead of n_tiles re-streams).
    true_buf_bytes = m_tiles * 8 * TM * 4        # (5, TM) pads to 8 sublanes
    true_resident = true_buf_bytes <= _RESIDENT_TRUE_BYTES
    if true_resident:
        true_spec = pl.BlockSpec((1, m_tiles, 5, TM), lambda b, n, m: (b, 0, 0, 0))
    else:
        true_spec = pl.BlockSpec((1, 1, 5, TM), lambda b, n, m: (b, m, 0, 0))

    # Explicit VMEM budget (capped for v7x's 64 MiB physical VMEM).
    vmem_bytes = (
        2 * TN * 128 * 4                                   # pred blocks
        + 2 * (true_buf_bytes if true_resident else 8 * TM * 4)
        + 2 * 8 * TN * 4 + 2 * 8 * TM * 4                  # d1 / d2p out blocks
        + TN * 128 * 4                                     # d1 lane-partial acc
        + 4 * TN * TM * 4)                                 # dist + temporaries
    vmem_limit = max(32 * 1024 * 1024,
                     min(64 * 1024 * 1024, int(1.5 * vmem_bytes)))

    kernel = functools.partial(_chamfer_kernel, true_resident=true_resident)

    d1, d2p = pl.pallas_call(
        kernel,
        out_shape=(
            jax.ShapeDtypeStruct((B, 1, N_pad), jnp.float32),
            jax.ShapeDtypeStruct((B, n_tiles, 1, M_pad), jnp.float32),
        ),
        grid_spec=pltpu.PrefetchScalarGridSpec(
            num_scalar_prefetch=0,
            grid=(B, n_tiles, m_tiles),
            in_specs=[
                pl.BlockSpec((1, TN, 5), lambda b, n, m: (b, n, 0)),
                true_spec,
            ],
            out_specs=[
                pl.BlockSpec((1, 1, TN), lambda b, n, m: (b, 0, n)),
                pl.BlockSpec((1, 1, 1, TM), lambda b, n, m: (b, n, 0, m)),
            ],
            scratch_shapes=[pltpu.VMEM((TN, 128), jnp.float32)],
        ),
        compiler_params=pltpu.CompilerParams(
            dimension_semantics=("parallel", "parallel", "arbitrary"),
            vmem_limit_bytes=vmem_limit),
    )(pred_aug, true_aug)

    # Finish d2: min over N tiles, clamp, sqrt; drop sentinel padding.
    d2 = jnp.sqrt(jnp.maximum(jnp.min(d2p, axis=1), 0.0))     # (B, 1, M_pad)
    return d1[:, :, :N], d2[:, :, :M]


def cd_loss(y_pred, y_true, *, tn=None, tm=None):
    """CDLoss.forward: (mean(sqrt(d1)) + mean(sqrt(d2))) / 2."""
    d1, d2 = chamfer_sqrt_dists(y_pred, y_true, tn=tn, tm=tm)
    return (jnp.mean(d1) + jnp.mean(d2)) * 0.5


def _ref_loss(y_pred, y_true):
    diff = y_pred[:, :, None, :] - y_true[:, None, :, :]
    sq = jnp.sum(diff * diff, axis=-1)
    return 0.5 * (jnp.mean(jnp.sqrt(jnp.min(sq, axis=2)))
                  + jnp.mean(jnp.sqrt(jnp.min(sq, axis=1))))


if __name__ == "__main__":
    key = jax.random.PRNGKey(0)
    k1, k2, k3, k4, k5, k6 = jax.random.split(key, 6)

    # Case 1: tile-aligned small shapes.
    y_pred = jax.random.normal(k1, (2, 128, 3), dtype=jnp.float32)
    y_true = jax.random.normal(k2, (2, 128, 3), dtype=jnp.float32)
    loss = jax.jit(cd_loss)(y_pred, y_true)
    jax.block_until_ready(loss)
    ref = _ref_loss(y_pred, y_true)
    assert jnp.allclose(loss, ref, atol=1e-4, rtol=1e-4), (loss, ref)

    # Case 2: non-128-multiple shapes exercise the sentinel padding path
    # (and the multi-chunk single-pass reduction, TM = 256).
    y_pred2 = jax.random.normal(k3, (2, 100, 3), dtype=jnp.float32)
    y_true2 = jax.random.normal(k4, (2, 160, 3), dtype=jnp.float32)
    loss2 = jax.jit(cd_loss)(y_pred2, y_true2)
    jax.block_until_ready(loss2)
    ref2 = _ref_loss(y_pred2, y_true2)
    assert jnp.allclose(loss2, ref2, atol=1e-4, rtol=1e-4), (loss2, ref2)

    # Case 3: forced small tiles exercise the multi-N-tile / multi-M-tile path
    # (resident true + dynamic m index, accumulator carry across m, B == 1).
    y_pred3 = jax.random.normal(k5, (1, 300, 3), dtype=jnp.float32)
    y_true3 = jax.random.normal(k6, (1, 400, 3), dtype=jnp.float32)
    small_tiles_loss = jax.jit(functools.partial(cd_loss, tn=128, tm=128))
    loss3 = small_tiles_loss(y_pred3, y_true3)
    jax.block_until_ready(loss3)
    ref3 = _ref_loss(y_pred3, y_true3)
    assert jnp.allclose(loss3, ref3, atol=1e-4, rtol=1e-4), (loss3, ref3)

    print("KERNEL_OK")
</pallas_src>

<mosaic_0001>
module attributes {stable_mosaic.version = 11 : i64} {
  func.func @_chamfer_kernel(%arg0: i32, %arg1: i32, %arg2: i32, %arg3: memref<1x128x5xf32, #tpu.memory_space<vmem>>, %arg4: memref<1x1x5x128xf32, #tpu.memory_space<vmem>>, %arg5: memref<1x1x128xf32, #tpu.memory_space<vmem>>, %arg6: memref<1x1x1x128xf32, #tpu.memory_space<vmem>>, %arg7: memref<128x128xf32, #tpu.memory_space<vmem>>) attributes {dimension_semantics = [#tpu.dimension_semantics<parallel>, #tpu.dimension_semantics<parallel>, #tpu.dimension_semantics<arbitrary>], iteration_bounds = array<i64: 2, 1, 1>, scalar_prefetch = 0 : i64, scratch_operands = 1 : i64, tpu.core_type = #tpu.core_type<tc>, window_params = [{transform_indices = @transform_0, window_bounds = array<i64: 1, 128, 5>}, {transform_indices = @transform_1, window_bounds = array<i64: 1, 1, 5, 128>}, {transform_indices = @transform_2, window_bounds = array<i64: 1, 1, 128>}, {transform_indices = @transform_3, window_bounds = array<i64: 1, 1, 1, 128>}]} {
    %c0_i32 = arith.constant 0 : i32
    %0 = arith.cmpi eq, %arg2, %c0_i32 : i32
    %1 = arith.extui %0 : i1 to i32
    %c0_i32_0 = arith.constant 0 : i32
    %2 = arith.cmpi ne, %1, %c0_i32_0 : i32
    scf.if %2 {
      %cst_17 = arith.constant 0x7F800000 : f32
      %20 = vector.broadcast %cst_17 : f32 to vector<128x128xf32>
      %c0_18 = arith.constant 0 : index
      %c0_19 = arith.constant 0 : index
      %21 = vector.load %arg7[%c0_18, %c0_19] : memref<128x128xf32, #tpu.memory_space<vmem>>, vector<128x128xf32>
      tpu.vector_store %arg7[%c0_18, %c0_19], %20 {strides = array<i32>} : memref<128x128xf32, #tpu.memory_space<vmem>>, vector<128x128xf32>,
    } else {
    }
    %c0 = arith.constant 0 : index
    %c0_1 = arith.constant 0 : index
    %c0_2 = arith.constant 0 : index
    %3 = vector.load %arg3[%c0, %c0_1, %c0_2] : memref<1x128x5xf32, #tpu.memory_space<vmem>>, vector<1x128x5xf32>
    %4 = vector.shape_cast %3 : vector<1x128x5xf32> to vector<128x5xf32>
    %c0_3 = arith.constant 0 : index
    %5 = arith.index_cast %arg2 : i32 to index
    %c0_4 = arith.constant 0 : index
    %c0_5 = arith.constant 0 : index
    %6 = vector.load %arg4[%c0_3, %5, %c0_4, %c0_5] : memref<1x1x5x128xf32, #tpu.memory_space<vmem>>, vector<1x1x5x128xf32>
    %7 = vector.shape_cast %6 : vector<1x1x5x128xf32> to vector<5x128xf32>
    %cst = arith.constant dense<0.000000e+00> : vector<128x128xf32>
    %8 = tpu.matmul %4, %7, %cst {dimension_numbers = #tpu.dot_dimension_numbers<[1], [0], [0], [1], [0, 0, 1, 1], [], []>} : vector<128x5xf32>, vector<5x128xf32>, vector<128x128xf32> -> vector<128x128xf32>
    %c0_6 = arith.constant 0 : index
    %c0_7 = arith.constant 0 : index
    %9 = vector.load %arg7[%c0_6, %c0_7] : memref<128x128xf32, #tpu.memory_space<vmem>>, vector<128x128xf32>
    %10 = arith.minimumf %9, %8 : vector<128x128xf32>
    %cst_8 = arith.constant dense<0x7F800000> : vector<128xf32>
    %11 = vector.multi_reduction <minimumf>, %8, %cst_8 [0] : vector<128x128xf32> to vector<128xf32>
    %12 = vector.shape_cast %11 : vector<128xf32> to vector<1x128xf32>
    %c0_9 = arith.constant 0 : index
    %c0_10 = arith.constant 0 : index
    %13 = vector.load %arg7[%c0_9, %c0_10] : memref<128x128xf32, #tpu.memory_space<vmem>>, vector<128x128xf32>
    tpu.vector_store %arg7[%c0_9, %c0_10], %10 {strides = array<i32>} : memref<128x128xf32, #tpu.memory_space<vmem>>, vector<128x128xf32>,
    %c0_11 = arith.constant 0 : index
    %c0_12 = arith.constant 0 : index
    %c0_13 = arith.constant 0 : index
    %c0_14 = arith.constant 0 : index
    %14 = vector.load %arg6[%c0_11, %c0_12, %c0_13, %c0_14] : memref<1x1x1x128xf32, #tpu.memory_space<vmem>>, vector<1x1x1x128xf32>
    %15 = vector.shape_cast %14 : vector<1x1x1x128xf32> to vector<1x128xf32>
    %16 = vector.shape_cast %12 : vector<1x128xf32> to vector<1x1x1x128xf32>
    tpu.vector_store %arg6[%c0_11, %c0_12, %c0_13, %c0_14], %16 {strides = array<i32>} : memref<1x1x1x128xf32, #tpu.memory_space<vmem>>, vector<1x1x1x128xf32>,
    %c0_i32_15 = arith.constant 0 : i32
    %17 = arith.cmpi eq, %arg2, %c0_i32_15 : i32
    %18 = arith.extui %17 : i1 to i32
    %c0_i32_16 = arith.constant 0 : i32
    %19 = arith.cmpi ne, %18, %c0_i32_16 : i32
    scf.if %19 {
      %cst_17 = arith.constant dense<0x7F800000> : vector<128xf32>
      %20 = vector.multi_reduction <minimumf>, %10, %cst_17 [1] : vector<128x128xf32> to vector<128xf32>
      %21 = vector.shape_cast %20 : vector<128xf32> to vector<128x1xf32>
      %cst_18 = arith.constant 0.000000e+00 : f32
      %22 = vector.broadcast %cst_18 : f32 to vector<128x1xf32>
      %23 = arith.maximumf %21, %22 : vector<128x1xf32>
      %24 = math.sqrt %23 : vector<128x1xf32>
      %25 = vector.shape_cast %24 : vector<128x1xf32> to vector<128xf32>
      %c0_19 = arith.constant 0 : index
      %c0_20 = arith.constant 0 : index
      %c0_21 = arith.constant 0 : index
      %26 = vector.load %arg5[%c0_19, %c0_20, %c0_21] : memref<1x1x128xf32, #tpu.memory_space<vmem>>, vector<1x1x128xf32>
      %27 = vector.shape_cast %26 : vector<1x1x128xf32> to vector<128xf32>
      %28 = vector.shape_cast %25 : vector<128xf32> to vector<1x1x128xf32>
      tpu.vector_store %arg5[%c0_19, %c0_20, %c0_21], %28 {strides = array<i32>} : memref<1x1x128xf32, #tpu.memory_space<vmem>>, vector<1x1x128xf32>,
    } else {
    }
    return
  }
  func.func @transform_0(%arg0: i32, %arg1: i32, %arg2: i32) -> (i32, i32, i32) {
    %c0_i32 = arith.constant 0 : i32
    %c0_i32_0 = arith.constant 0 : i32
    return %arg0, %arg1, %c0_i32 : i32, i32, i32
  }
  func.func @transform_1(%arg0: i32, %arg1: i32, %arg2: i32) -> (i32, i32, i32, i32) {
    %c0_i32 = arith.constant 0 : i32
    %c0_i32_0 = arith.constant 0 : i32
    %c0_i32_1 = arith.constant 0 : i32
    %c0_i32_2 = arith.constant 0 : i32
    return %arg0, %c0_i32, %c0_i32_0, %c0_i32_1 : i32, i32, i32, i32
  }
  func.func @transform_2(%arg0: i32, %arg1: i32, %arg2: i32) -> (i32, i32, i32) {
    %c0_i32 = arith.constant 0 : i32
    %c0_i32_0 = arith.constant 0 : i32
    return %arg0, %c0_i32, %arg1 : i32, i32, i32
  }
  func.func @transform_3(%arg0: i32, %arg1: i32, %arg2: i32) -> (i32, i32, i32, i32) {
    %c0_i32 = arith.constant 0 : i32
    %c0_i32_0 = arith.constant 0 : i32
    return %arg0, %arg1, %c0_i32, %arg2 : i32, i32, i32, i32
  }
}

</mosaic_0001>

<bundles_post_ra>
// kernel: cd_loss.1
= control target key start
LH: loop header
LB: loop body
LE: loop exit
PB: predicated region body
PF: predicated region fallthrough
CT: control target
= control target key end

     0   :  { %s1157_s12 = smov 0   ;;  %s1159_s13 = smov 0   ;;  %s1543_s0 = inlined_call_operand.vmem [shape: f32[2,128,5], index: 0, kind: input, shape index: {}]   ;;  %s1544_s1 = inlined_call_operand.vmem [shape: f32[2,1,5,128], index: 1, kind: input, shape index: {}]   ;;  %s1545_s2 = inlined_call_operand.vmem [shape: f32[2,1,128], index: 2, kind: output, shape index: {0}]   ;;  %s1546_s3 = inlined_call_operand.vmem [shape: f32[2,1,1,128], index: 3, kind: output, shape index: {1}]  }
   0x1   :  { %s1161_s14 = smov 0  }
   0x2 LB: > { %s33_s15 = sadd.s32 1, %s1131_s13  ;;  %p988_p0 = scmp.ge.s32.totalorder %s1135_s14, 1  ;;  %s1135_s14 = sphi %s1161_s14, %s14_s14   ;;  %s1131_s13 = sphi %s1159_s13, %s1552_s13   ;;  %s1127_s12 = sphi %s1157_s12, %s1551_s12  }
   0x3   : > { %p35_p1 = scmp.ge.s32.totalorder %s33_s15, 2  ;;  %p181_p2 = scmp.lt.s32.totalorder %s1135_s14, 3 }
   0x5   : > { %s1554_s15 = smov (%p35_p1, %s33_s15), 0  ;;  %p182_p3 = pnand %p988_p0, %p181_p2 }
   0x6   : > { %p224_p4 = scmp.lt.s32.totalorder (!%p182_p3), %s1127_s12, 1 }
   0x7   : > { %185 = sbr.rel (%p182_p3) target bundleno = 408 (0x198), region = 28 }
   0xc   : > { %s1556_s12 = smov (!%p224_p4, %s1127_s12), 1  ;;  %vm340_vm0 = vcmask 1044480   ;;  %vm291_vm1 = vcmask 39936   ;;  %v738_v54 = vlaneseq  ;;  %vm749_vm10 = vcmask 130112  }
   0xd   : > { %s1011_s16 = sshll.u32 %s1556_s12, 7  ;;  %s991_s17 = sshll.u32 %s1556_s12, 3  ;;  %vm756_vm12 = vcmask 195712  }
   0xe   : > { %s1182_s20 = scalar_lea.vmem %s1543_s0, %s1011_s16  ;;  %s236_s23 = scalar_lea.vmem %s1544_s1, %s991_s17  ;;  %v1227_v59 = vand.u32 127, %v738_v54  ;;  %v1233_v63 = vshrl.u32 %v738_v54, 7 }
   0xf   : > { %v290_v0 = vld [vmem:[%s236_s23] sm:$0x1f]  ;;  %v273_v3 = vld [vmem:[%s1182_s20 + $0x8] sm:$0xff]  ;;  %v274_v5 = vld [vmem:[%s1182_s20 + $0x10] sm:$0xff]  ;;  %s251_s26 = scalar_lea.vmem %s1546_s3, %s1556_s12  ;;  %s242_s29 = scalar_lea.vmem %s1545_s2, %s1556_s12 }
  0x10   : > { %v272_v1 = vld [vmem:[%s1182_s20] sm:$0xff]  ;;  %1029 = vmatprep.subr.msk.mxu0 %vm340_vm0, %v290_v0  ;;  %1055 = vmatprep.subr.msk.mxu1 %vm340_vm0, %v290_v0  ;;  %v281_v4 = vld [vmem:[%s1182_s20 + $0x48] sm:$0xff]  ;;  %v282_v6 = vld [vmem:[%s1182_s20 + $0x50] sm:$0xff] }
  0x11   : > { %v280_v2 = vld [vmem:[%s1182_s20 + $0x40] sm:$0xff]  ;;  %1030 = vmatpush3.msk.msra.mxu0 %vm340_vm0, %v290_v0  ;;  %1056 = vmatpush3.msk.msra.mxu1 %vm340_vm0, %v290_v0  ;;  %v275_v7 = vld [vmem:[%s1182_s20 + $0x18] sm:$0xff]  ;;  %v277_v11 = vld [vmem:[%s1182_s20 + $0x28] sm:$0xff]  ;;  %v1236_v0 = vadd.s32 4294967224, %v1227_v59 }
  0x12   : > { %1031 = vmatprep.mubr.msk.f32.mxu0 %vm291_vm1, %v272_v1  ;;  %1043 = vmatprep.mubr.msk.f32.mxu1 %vm291_vm1, %v280_v2  ;;  %v283_v8 = vld [vmem:[%s1182_s20 + $0x58] sm:$0xff]  ;;  %v276_v9 = vld [vmem:[%s1182_s20 + $0x20] sm:$0xff]  ;;  %v285_v12 = vld [vmem:[%s1182_s20 + $0x68] sm:$0xff] }
  0x13   : > { %1032 = vmatmul.mubr.msk.f32.vlgmr.msra.gmra.mxu0 %vm291_vm1, %v273_v3  ;;  %1044 = vmatmul.mubr.msk.f32.vlgmr.msra.gmra.mxu1 %vm291_vm1, %v281_v4  ;;  %v284_v10 = vld [vmem:[%s1182_s20 + $0x60] sm:$0xff]  ;;  %v278_v13 = vld [vmem:[%s1182_s20 + $0x30] sm:$0xff]  ;;  %v279_v15 = vld [vmem:[%s1182_s20 + $0x38] sm:$0xff]  ;;  %v1242_v4 = vadd.s32 4294967288, %v1227_v59 }
  0x14   : > { %1034 = vmatprep.mubr.msk.f32.mxu0 %vm291_vm1, %v274_v5  ;;  %1046 = vmatprep.mubr.msk.f32.mxu1 %vm291_vm1, %v282_v6  ;;  %v286_v14 = vld [vmem:[%s1182_s20 + $0x70] sm:$0xff]  ;;  %v287_v16 = vld [vmem:[%s1182_s20 + $0x78] sm:$0xff]  ;;  %v803_v5 = vsub.s32 %v1236_v0, %v1233_v63 }
  0x17   : > { %1035 = vmatmul.mubr.msk.f32.gmra.mxu0 %vm291_vm1, %v275_v7  ;;  %1047 = vmatmul.mubr.msk.f32.gmra.mxu1 %vm291_vm1, %v283_v8  ;;  %v747_v8 = vsub.s32 %v1242_v4, %v1233_v63 }
  0x18   : > { %1037 = vmatprep.mubr.msk.f32.mxu0 %vm291_vm1, %v276_v9  ;;  %1049 = vmatprep.mubr.msk.f32.mxu1 %vm291_vm1, %v284_v10  ;;  %v1250_v9 = vadd.s32 4294967272, %v1227_v59 }
  0x1b   : > { %1038 = vmatmul.mubr.msk.f32.gmra.mxu0 %vm291_vm1, %v277_v11  ;;  %1050 = vmatmul.mubr.msk.f32.gmra.mxu1 %vm291_vm1, %v285_v12  ;;  %v1257_v12 = vadd.s32 4294967232, %v1227_v59 }
  0x1c   : > { %1040 = vmatprep.mubr.msk.f32.mxu0 %vm291_vm1, %v278_v13  ;;  %1052 = vmatprep.mubr.msk.f32.mxu1 %vm291_vm1, %v286_v14  ;;  %v1260_v13 = vadd.s32 4294967208, %v1227_v59 }
  0x1f   : > { %1041 = vmatmul.mubr.msk.f32.gmra.mxu0 %vm291_vm1, %v279_v15  ;;  %1053 = vmatmul.mubr.msk.f32.gmra.mxu1 %vm291_vm1, %v287_v16  ;;  %v1265_v15 = vadd.s32 4294967216, %v1227_v59  ;;  %v1268_v16 = vadd.s32 4294967280, %v1227_v59 }
  0xd3   : > { %v1033_v17 = vpop.f32.mrf.mxu0  ;;  %v1045_v18 = vpop.f32.mrf.mxu1 }
  0xd4   : > { %580 = vmin.xlane.f32.xlu1 %v1045_v18  ;;  %564 = vmin.xlane.f32.xlu0 %v1033_v17 }
  0xd5   : > { %v410_v19 = vpop.f32.mrf.mxu0  ;;  %v450_v20 = vpop.f32.mrf.mxu1 }
  0xd7   : > { %v1036_v21 = vpop.f32.mrf.mxu0  ;;  %v1048_v22 = vpop.f32.mrf.mxu1 }
  0xd8   : > { %562 = vmin.xlane.f32.xlu0 %v410_v19  ;;  %568 = vmin.xlane.f32.xlu1 %v1036_v21 }
  0xd9   : > { %v420_v23 = vpop.f32.mrf.mxu0  ;;  %v460_v24 = vpop.f32.mrf.mxu1 }
  0xdb   : > { %v1039_v25 = vpop.f32.mrf.mxu0  ;;  %v1051_v26 = vpop.f32.mrf.mxu1 }
  0xdc   : > { %578 = vmin.xlane.f32.xlu0 %v450_v20  ;;  %584 = vmin.xlane.f32.xlu1 %v1048_v22  ;;  %v522_v29 = vmin.f32 %v1033_v17, %v1039_v25  ;;  %v1271_v17 = vadd.s32 4294967256, %v1227_v59 }
  0xdd   : > { %v430_v27 = vpop.f32.mrf.mxu0  ;;  %v470_v28 = vpop.f32.mrf.mxu1 }
  0xde   : > { %v521_v30 = vmin.f32 %v410_v19, %v430_v27  ;;  %v526_v36 = vmin.f32 %v522_v29, %v1045_v18  ;;  %v1274_v18 = vadd.s32 4294967264, %v1227_v59  ;;  %v1277_v19 = vadd.s32 4294967240, %v1227_v59 }
  0xdf   : > { %v1042_v31 = vpop.f32.mrf.mxu0  ;;  %v1054_v32 = vpop.f32.mrf.mxu1  ;;  %v761_v29 = vsub.s32 %v1250_v9, %v1233_v63 }
  0xe0   : > { %v524_v33 = vmin.f32 %v1036_v21, %v1042_v31  ;;  %582 = vmin.xlane.f32.xlu0 %v460_v24  ;;  %566 = vmin.xlane.f32.xlu1 %v420_v23  ;;  %v525_v34 = vmin.f32 %v521_v30, %v450_v20  ;;  %v530_v42 = vmin.f32 %v526_v36, %v1051_v26 }
  0xe1   : > { %v440_v35 = vpop.f32.mrf.mxu0  ;;  %v480_v39 = vpop.f32.mrf.mxu1  ;;  %v796_v30 = vsub.s32 %v1257_v12, %v1233_v63  ;;  %v775_v36 = vsub.s32 %v1271_v17, %v1233_v63  ;;  %v1548_v12 = vsub.s32 %v1265_v15, %v1233_v63 }
  0xe2   : > { %v523_v37 = vmin.f32 %v420_v23, %v440_v35  ;;  %v528_v38 = vmin.f32 %v524_v33, %v1048_v22  ;;  %v529_v40 = vmin.f32 %v525_v34, %v470_v28  ;;  %v1281_v22 = vadd.s32 4294967248, %v1227_v59 }
  0xe3   : > { %v1284_v23 = vadd.s32 4294967192, %v1227_v59  ;;  %v754_v34 = vsub.s32 %v1268_v16, %v1233_v63 }
  0xe4   : > { %572 = vmin.xlane.f32.xlu1 %v1039_v25  ;;  %570 = vmin.xlane.f32.xlu0 %v430_v27  ;;  %v527_v41 = vmin.f32 %v523_v37, %v460_v24  ;;  %v532_v43 = vmin.f32 %v528_v38, %v1054_v32  ;;  %v533_v45 = vmin.f32 %v529_v40, %v530_v42  ;;  %v1287_v24 = vadd.s32 4294967200, %v1227_v59 }
  0xe5   : > { %v768_v37 = vsub.s32 %v1274_v18, %v1233_v63  ;;  %v789_v38 = vsub.s32 %v1277_v19, %v1233_v63  ;;  %v782_v42 = vsub.s32 %v1281_v22, %v1233_v63 }
  0xe6   : > { %v531_v44 = vmin.f32 %v527_v41, %v480_v39 }
  0xe8   : > { %v534_v46 = vmin.f32 %v531_v44, %v532_v43  ;;  %576 = vmin.xlane.f32.xlu1 %v1042_v31  ;;  %574 = vmin.xlane.f32.xlu0 %v440_v35 }
  0xea   : > { %v535_v47 = vmin.f32 %v533_v45, %v534_v46  ;;  %v1327_v45 = vadd.s32 4294967176, %v1227_v59  ;;  %v1330_v46 = vadd.s32 4294967184, %v1227_v59 }
  0xec   : > { %v536_v48 = vrot.slane %v535_v47, 4  ;;  %588 = vmin.xlane.f32.xlu1 %v1051_v26  ;;  %586 = vmin.xlane.f32.xlu0 %v470_v28  ;;  %v742_v28 = vsub.s32 %v1227_v59, %v1233_v63 }
  0xee   : > { %v537_v49 = vmin.f32 %v535_v47, %v536_v48 }
  0xf0   : > { %v538_v50 = vrot.slane %v537_v49, 2  ;;  %592 = vmin.xlane.f32.xlu1 %v1054_v32  ;;  %590 = vmin.xlane.f32.xlu0 %v480_v39  ;;  %v817_v32 = vsub.s32 %v1260_v13, %v1233_v63 }
  0xf2   : > { %v539_v51 = vmin.f32 %v537_v49, %v538_v50 }
  0xf4   : > { %v540_v52 = vrot.slane %v539_v51, 1 }
  0xf6   : > { %v541_v53 = vmin.f32 %v539_v51, %v540_v52 }
  0xf8   : > { %558 = vst [vmem:[%s251_s26] sm:$0x1] %v541_v53 }
 0x15d   : > { %v581_v55 = vpop.xlane.xlu1 %580  ;;  %v565_v56 = vpop.xlane.xlu0 %564 }
 0x15e   : > { %v1223_v57 = vmax.f32 %v581_v55, 0.0  ;;  %v1225_v58 = vmax.f32 %v565_v56, 0.0 }
 0x160   : > { %1081 = vrsqrt.f32 %v1223_v57  ;;  %vm675_vm2 = vcmp.eq.f32.partialorder %v1223_v57, inf  ;;  %vm677_vm3 = vcmp.eq.f32.partialorder %v1223_v57, 0.0  ;;  %v678_v47 = vand.u32 2147483648, %v1223_v57 }
 0x161   : > { %v563_v60 = vpop.xlane.xlu0 %562  ;;  %v569_v61 = vpop.xlane.xlu1 %568  ;;  %1083 = vrsqrt.f32 %v1225_v58  ;;  %vm619_vm4 = vcmp.eq.f32.partialorder %v1225_v58, inf  ;;  %vm621_vm5 = vcmp.eq.f32.partialorder %v1225_v58, 0.0  ;;  %v622_v55 = vand.u32 2147483648, %v1225_v58 }
 0x162   : > { %v1229_v62 = vmax.f32 %v563_v60, 0.0  ;;  %v1239_v1 = vmax.f32 %v569_v61, 0.0 }
 0x164   : > { %1085 = vrsqrt.f32 %v1229_v62  ;;  %vm612_vm6 = vcmp.eq.f32.partialorder %v1229_v62, inf  ;;  %vm614_vm7 = vcmp.eq.f32.partialorder %v1229_v62, 0.0  ;;  %v615_v60 = vand.u32 2147483648, %v1229_v62 }
 0x165   : > { %v579_v2 = vpop.xlane.xlu0 %578  ;;  %v585_v3 = vpop.xlane.xlu1 %584  ;;  %1087 = vrsqrt.f32 %v1239_v1  ;;  %vm633_vm8 = vcmp.eq.f32.partialorder %v1239_v1, inf  ;;  %vm635_vm9 = vcmp.eq.f32.partialorder %v1239_v1, 0.0  ;;  %v636_v61 = vand.u32 2147483648, %v1239_v1 }
 0x166   : > { %v1252_v10 = vmax.f32 %v579_v2, 0.0  ;;  %v1262_v14 = vmax.f32 %v585_v3, 0.0 }
 0x168   : > { %v671_v3 = vand.u32 2147483648, %v1252_v10  ;;  %vm668_vm11 = vcmp.eq.f32.partialorder %v1252_v10, inf  ;;  %vm670_vm0 = vcmp.eq.f32.partialorder %v1252_v10, 0.0  ;;  %vm689_vm1 = vcmp.eq.f32.partialorder %v1262_v14, inf }
 0x169   : > { %v583_v6 = vpop.xlane.xlu0 %582  ;;  %v567_v7 = vpop.xlane.xlu1 %566 }
 0x16a   : > { %v1254_v11 = vmax.f32 %v567_v7, 0.0  ;;  %v1290_v25 = vmax.f32 %v583_v6, 0.0  ;;  %v692_v6 = vand.u32 2147483648, %v1262_v14 }
 0x16c   : > { %1089 = vrsqrt.f32 %v1254_v11  ;;  %vm626_vm13 = vcmp.eq.f32.partialorder %v1254_v11, inf  ;;  %vm628_vm14 = vcmp.eq.f32.partialorder %v1254_v11, 0.0 }
 0x16d   : > { %v573_v20 = vpop.xlane.xlu1 %572  ;;  %v571_v21 = vpop.xlane.xlu0 %570  ;;  %1091 = vrsqrt.f32 %v1252_v10 }
 0x16e   : > { %v1292_v26 = vmax.f32 %v573_v20, 0.0  ;;  %v1294_v27 = vmax.f32 %v571_v21, 0.0  ;;  %1093 = vrsqrt.f32 %v1262_v14  ;;  %v1082_v31 = vpop.eup %1081 }
 0x16f   : > { %v1084_v35 = vpop.eup %1083  ;;  %v674_v51 = vmul.f32 %v1082_v31, %v1223_v57  ;;  %v685_v31 = vand.u32 2147483648, %v1290_v25 }
 0x170   : > { %1095 = vrsqrt.f32 %v1292_v26  ;;  %v618_v48 = vmul.f32 %v1084_v35, %v1225_v58  ;;  %vm647_vm15 = vcmp.eq.f32.partialorder %v1292_v26, inf  ;;  %v643_v59 = vand.u32 2147483648, %v1294_v27 }
 0x171   : > { %1097 = vrsqrt.f32 %v1294_v27  ;;  %v577_v39 = vpop.xlane.xlu1 %576  ;;  %v575_v40 = vpop.xlane.xlu0 %574  ;;  %v676_v7 = vsel %vm675_vm2, %v1223_v57, %v674_v51  ;;  %vm649_vm2 = vcmp.eq.f32.partialorder %v1292_v26, 0.0 }
 0x172   : > { %v1086_v41 = vpop.eup %1085  ;;  %1099 = vrsqrt.f32 %v1290_v25  ;;  %v1334_v49 = vmax.f32 %v577_v39, 0.0  ;;  %v1336_v50 = vmax.f32 %v575_v40, 0.0  ;;  %v620_v2 = vsel %vm619_vm4, %v1225_v58, %v618_v48 }
 0x173   : > { %v611_v52 = vmul.f32 %v1086_v41, %v1229_v62  ;;  %v1088_v54 = vpop.eup %1087  ;;  %v629_v39 = vand.u32 2147483648, %v1254_v11  ;;  %v623_v48 = vsel %vm621_vm5, %v622_v55, %v620_v2  ;;  %v1374_v44 = vsel %vm677_vm3, %v678_v47, %v676_v7 }
 0x174   : > { %1101 = vrsqrt.f32 %v1334_v49  ;;  %v632_v21 = vmul.f32 %v1088_v54, %v1239_v1  ;;  %vm763_vm4 = vcmask 261312   ;;  %vm640_vm5 = vcmp.eq.f32.partialorder %v1294_v27, inf }
 0x175   : > { %v589_v53 = vpop.xlane.xlu1 %588  ;;  %v587_v56 = vpop.xlane.xlu0 %586  ;;  %1103 = vrsqrt.f32 %v1336_v50  ;;  %v613_v20 = vsel %vm612_vm6, %v1229_v62, %v611_v52  ;;  %vm682_vm3 = vcmp.eq.f32.partialorder %v1290_v25, inf  ;;  %vm770_vm6 = vcmask 326912  }
 0x176   : > { %v1368_v52 = vmax.f32 %v589_v53, 0.0  ;;  %v1370_v54 = vmax.f32 %v587_v56, 0.0  ;;  %v616_v33 = vsel %vm614_vm7, %v615_v60, %v613_v20  ;;  %v634_v57 = vsel %vm633_vm8, %v1239_v1, %v632_v21 }
 0x177   : > { %v748_v56 = vrot.slane %v623_v48, %v747_v8  ;;  %v743_v21 = vrot.slane %v616_v33, %v742_v28  ;;  %vm691_vm7 = vcmp.eq.f32.partialorder %v1262_v14, 0.0  ;;  %v637_v8 = vsel %vm635_vm9, %v636_v61, %v634_v57 }
 0x178   : > { %1105 = vrsqrt.f32 %v1368_v52  ;;  %vm684_vm8 = vcmp.eq.f32.partialorder %v1290_v25, 0.0  ;;  %vm784_vm9 = vcmask 458112   ;;  %v650_v61 = vand.u32 2147483648, %v1292_v26 }
 0x179   : > { %v1090_v35 = vpop.eup %1089  ;;  %v593_v40 = vpop.xlane.xlu1 %592  ;;  %1107 = vrsqrt.f32 %v1370_v54  ;;  %v699_v15 = vand.u32 2147483648, %v1370_v54 }
 0x17a   : > { %v1092_v41 = vpop.eup %1091  ;;  %v625_v51 = vmul.f32 %v1090_v35, %v1254_v11  ;;  %v591_v58 = vpop.xlane.xlu0 %590  ;;  %v1390_v47 = vmax.f32 %v593_v40, 0.0  ;;  %v750_v40 = vsel %vm749_vm10, %v748_v56, %v743_v21  ;;  %vm805_vm10 = vcmask 654912  }
 0x17b   : > { %v1094_v43 = vpop.eup %1093  ;;  %v667_v60 = vmul.f32 %v1092_v41, %v1252_v10  ;;  %v1405_v4 = vmax.f32 %v591_v58, 0.0 }
 0x17c   : > { %v627_v62 = vsel %vm626_vm13, %v1254_v11, %v625_v51  ;;  %vm642_vm13 = vcmp.eq.f32.partialorder %v1294_v27, 0.0  ;;  %v688_v28 = vmul.f32 %v1094_v43, %v1262_v14  ;;  %1109 = vrsqrt.f32 %v1390_v47 }
 0x17d   : > { %v1096_v53 = vpop.eup %1095  ;;  %v630_v2 = vsel %vm628_vm14, %v629_v39, %v627_v62  ;;  %v669_v16 = vsel %vm668_vm11, %v1252_v10, %v667_v60  ;;  %vm791_vm14 = vcmask 523712   ;;  %1111 = vrsqrt.f32 %v1405_v4 }
 0x17e   : > { %v1098_v55 = vpop.eup %1097  ;;  %v646_v7 = vmul.f32 %v1096_v53, %v1292_v26  ;;  %v755_v11 = vrot.slane %v630_v2, %v754_v34  ;;  %v672_v9 = vsel %vm670_vm0, %v671_v3, %v669_v16  ;;  %vm663_vm11 = vcmp.eq.f32.partialorder %v1334_v49, 0.0 }
 0x17f   : > { %v1100_v20 = vpop.eup %1099  ;;  %v639_v35 = vmul.f32 %v1098_v55, %v1294_v27  ;;  %vm819_vm0 = vcmask 786112   ;;  %v657_v55 = vand.u32 2147483648, %v1336_v50 }
 0x180   : > { %v648_v33 = vsel %vm647_vm15, %v1292_v26, %v646_v7  ;;  %v681_v34 = vmul.f32 %v1100_v20, %v1290_v25  ;;  %vm661_vm15 = vcmp.eq.f32.partialorder %v1334_v49, inf  ;;  %v757_v41 = vsel %vm756_vm12, %v755_v11, %v750_v40 }
 0x181   : > { %v641_v1 = vsel %vm640_vm5, %v1294_v27, %v639_v35  ;;  %v1102_v39 = vpop.eup %1101  ;;  %v762_v27 = vrot.slane %v637_v8, %v761_v29  ;;  %vm798_vm5 = vcmask 589312   ;;  %v651_v48 = vsel %vm649_vm2, %v650_v61, %v648_v33 }
 0x182   : > { %v644_v43 = vsel %vm642_vm13, %v643_v59, %v641_v1  ;;  %v660_v58 = vmul.f32 %v1102_v39, %v1334_v49  ;;  %v1104_v53 = vpop.eup %1103  ;;  %v690_v29 = vsel %vm689_vm1, %v1262_v14, %v688_v28  ;;  %v664_v26 = vand.u32 2147483648, %v1334_v49 }
 0x183   : > { %v769_v51 = vrot.slane %v644_v43, %v768_v37  ;;  %vm812_vm12 = vcmask 720512   ;;  %v683_v18 = vsel %vm682_vm3, %v1290_v25, %v681_v34  ;;  %v653_v57 = vmul.f32 %v1104_v53, %v1336_v50 }
 0x184   : > { %v662_v37 = vsel %vm661_vm15, %v1334_v49, %v660_v58  ;;  %vm654_vm2 = vcmp.eq.f32.partialorder %v1336_v50, inf  ;;  %v776_v10 = vrot.slane %v651_v48, %v775_v36  ;;  %v764_v3 = vsel %vm763_vm4, %v762_v27, %v757_v41 }
 0x185   : > { %v665_v62 = vsel %vm663_vm11, %v664_v26, %v662_v37  ;;  %v693_v56 = vsel %vm691_vm7, %v692_v6, %v690_v29  ;;  %v771_v49 = vsel %vm770_vm6, %v769_v51, %v764_v3  ;;  %v655_v60 = vsel %vm654_vm2, %v1336_v50, %v653_v57  ;;  %v1106_v6 = vpop.eup %1105 }
 0x186   : > { %vm656_vm1 = vcmp.eq.f32.partialorder %v1336_v50, 0.0  ;;  %vm826_vm3 = vcmask 851712   ;;  %v686_v17 = vsel %vm684_vm8, %v685_v31, %v683_v18  ;;  %v790_v36 = vrot.slane %v665_v62, %v789_v38 }
 0x187   : > { %v658_v2 = vsel %vm656_vm1, %v657_v55, %v655_v60  ;;  %v845_v14 = vsub.s32 %v1327_v45, %v1233_v63  ;;  %vm833_vm4 = vcmask 917312   ;;  %v804_v50 = vrot.slane %v1374_v44, %v803_v5  ;;  %v1108_v5 = vpop.eup %1107 }
 0x188   : > { %v797_v25 = vrot.slane %v672_v9, %v796_v30  ;;  %v783_v19 = vrot.slane %v658_v2, %v782_v42  ;;  %v838_v38 = vsub.s32 %v1330_v46, %v1233_v63  ;;  %v818_v45 = vrot.slane %v693_v56, %v817_v32 }
 0x189   : > { %vm1547_vm6 = vcmask 392512   ;;  %v702_v0 = vmul.f32 %v1106_v6, %v1368_v52  ;;  %vm703_vm7 = vcmp.eq.f32.partialorder %v1368_v52, inf  ;;  %v811_v30 = vrot.slane %v686_v17, %v1548_v12  ;;  %v1110_v46 = vpop.eup %1109 }
 0x18a   : > { %v778_v31 = vsel %vm1547_vm6, %v776_v10, %v771_v49  ;;  %vm705_vm8 = vcmp.eq.f32.partialorder %v1368_v52, 0.0  ;;  %v706_v42 = vand.u32 2147483648, %v1368_v52  ;;  %v695_v44 = vmul.f32 %v1108_v5, %v1370_v54  ;;  %v1112_v8 = vpop.eup %1111 }
 0x18b   : > { %v785_v22 = vsel %vm784_vm9, %v783_v19, %v778_v31  ;;  %v704_v32 = vsel %vm703_vm7, %v1368_v52, %v702_v0  ;;  %vm696_vm13 = vcmp.eq.f32.partialorder %v1370_v54, inf  ;;  %vm698_vm15 = vcmp.eq.f32.partialorder %v1370_v54, 0.0 }
 0x18c   : > { %v792_v13 = vsel %vm791_vm14, %v790_v36, %v785_v22  ;;  %vm717_vm9 = vcmp.eq.f32.partialorder %v1390_v47, inf  ;;  %v707_v20 = vsel %vm705_vm8, %v706_v42, %v704_v32  ;;  %v697_v35 = vsel %vm696_vm13, %v1370_v54, %v695_v44 }
 0x18d   : > { %v799_v7 = vsel %vm798_vm5, %v797_v25, %v792_v13  ;;  %v716_v52 = vmul.f32 %v1110_v46, %v1390_v47  ;;  %v700_v59 = vsel %vm698_vm15, %v699_v15, %v697_v35  ;;  %vm719_vm14 = vcmp.eq.f32.partialorder %v1390_v47, 0.0 }
 0x18e   : > { %v806_v21 = vsel %vm805_vm10, %v804_v50, %v799_v7  ;;  %v720_v28 = vand.u32 2147483648, %v1390_v47  ;;  %v1549_v1 = vsub.s32 %v1287_v24, %v1233_v63  ;;  %v709_v54 = vmul.f32 %v1112_v8, %v1405_v4 }
 0x18f   : > { %v813_v11 = vsel %vm812_vm12, %v811_v30, %v806_v21  ;;  %v718_v34 = vsel %vm717_vm9, %v1390_v47, %v716_v52  ;;  %v1550_v61 = vsub.s32 %v1284_v23, %v1233_v63  ;;  %vm710_vm5 = vcmp.eq.f32.partialorder %v1405_v4, inf }
 0x190   : > { %v820_v33 = vsel %vm819_vm0, %v818_v45, %v813_v11  ;;  %v825_v16 = vrot.slane %v700_v59, %v1549_v1  ;;  %v721_v39 = vsel %vm719_vm14, %v720_v28, %v718_v34  ;;  %v713_v40 = vand.u32 2147483648, %v1405_v4 }
 0x191   : > { %v832_v43 = vrot.slane %v707_v20, %v1550_v61  ;;  %v711_v41 = vsel %vm710_vm5, %v1405_v4, %v709_v54  ;;  %vm712_vm10 = vcmp.eq.f32.partialorder %v1405_v4, 0.0  ;;  %v846_v24 = vrot.slane %v721_v39, %v845_v14 }
 0x192   : > { %v827_v27 = vsel %vm826_vm3, %v825_v16, %v820_v33  ;;  %vm840_vm11 = vcmask 982912   ;;  %v714_v48 = vsel %vm712_vm10, %v713_v40, %v711_v41  ;;  %vm847_vm12 = vcmask 1048512  }
 0x193   : > { %v834_v47 = vsel %vm833_vm4, %v832_v43, %v827_v27  ;;  %v839_v51 = vrot.slane %v714_v48, %v838_v38 }
 0x195   : > { %v841_v63 = vsel %vm840_vm11, %v839_v51, %v834_v47 }
 0x196   : > { %v848_v23 = vsel %vm847_vm12, %v846_v24, %v841_v63 }
 0x197   : > { %850 = vst [vmem:[%s242_s29] sm:$0x1] %v848_v23 }
 0x198 PF: > { %s14_s14 = sadd.s32 1, %s1135_s14   ;;  %s1551_s12 = smov %s1131_s13 }
 0x199   : > { %p11_p5 = scmp.ge.s32.totalorder %s14_s14, 4   ;;  %s1552_s13 = smov %s1554_s15 }
 0x19b   :  { %13 = sbr.rel (!%p11_p5) target bundleno = 2 (0x2), region = 82 }

</bundles_post_ra>
